<compile_context>
chip_gen: v5e
topology: v5e:2x2
jax: 0.10.0
libtpu: 0.0.40
codegen_flags: <defaults>
</compile_context>

<pallas_src>
import functools

import jax
import jax.numpy as jnp
from jax.experimental import pallas as pl
from jax.experimental.pallas import tpu as pltpu


def _mean_sq_diff_kernel(a_ref, b_ref, o_ref, *, inv_count):
    """Accumulates sum((a-b)^2) over the K (lane) axis; scales by 1/K at end."""
    k = pl.program_id(1)

    @pl.when(k == 0)
    def _():
        o_ref[...] = jnp.zeros_like(o_ref)

    d = a_ref[...].astype(jnp.float32) - b_ref[...].astype(jnp.float32)
    o_ref[...] += jnp.sum(d * d, axis=1, keepdims=True)

    @pl.when(k == pl.num_programs(1) - 1)
    def _():
        o_ref[...] = o_ref[...] * inv_count  # mean = sum * (1/K), no divide


def _choose_block(dim, align, max_blk):
    """Pick a block size (multiple of `align`, <= max_blk) and padded extent."""
    padded = -(-dim // align) * align
    if padded <= max_blk:
        return padded, padded
    blk = max_blk  # max_blk is a multiple of align
    padded = -(-dim // blk) * blk
    return blk, padded


def _level_mean_sq_diff(a, b):
    """Per-(n,c) spatial mean of (a-b)^2 for one feature level. Returns (N*C,)."""
    assert a.shape == b.shape
    N, C, H, W = a.shape
    R, K = N * C, H * W

    a2 = a.reshape(R, K)
    b2 = b.reshape(R, K)

    r_blk, r_pad = _choose_block(R, 8, 256)      # sublane axis
    k_blk, k_pad = _choose_block(K, 128, 2048)   # lane axis (128-dense)

    if (r_pad, k_pad) != (R, K):
        a2 = jnp.pad(a2, ((0, r_pad - R), (0, k_pad - K)))
        b2 = jnp.pad(b2, ((0, r_pad - R), (0, k_pad - K)))

    grid = (r_pad // r_blk, k_pad // k_blk)
    kernel = functools.partial(_mean_sq_diff_kernel, inv_count=1.0 / float(K))

    out = pl.pallas_call(
        kernel,
        out_shape=jax.ShapeDtypeStruct((r_pad, 1), jnp.float32),
        grid_spec=pltpu.PrefetchScalarGridSpec(
            num_scalar_prefetch=0,
            grid=grid,
            in_specs=[
                pl.BlockSpec((r_blk, k_blk), lambda i, k: (i, k)),
                pl.BlockSpec((r_blk, k_blk), lambda i, k: (i, k)),
            ],
            out_specs=pl.BlockSpec((r_blk, 1), lambda i, k: (i, 0)),
        ),
        compiler_params=pltpu.CompilerParams(
            dimension_semantics=("parallel", "arbitrary")
        ),
    )(a2, b2)

    return out[:R, 0]


def lpips_metric(img1_feats, img2_feats):
    """Forward of LPIPS_Metric: sum over 5 levels of per-(n,c) spatial MSE."""
    assert len(img1_feats) == len(img2_feats) == 5
    # .detach() in the PyTorch module is a no-op here (no autograd state).
    res_sum = None
    for a, b in zip(img1_feats, img2_feats):
        r = _level_mean_sq_diff(a, b)
        if res_sum is None:
            res_sum = r
        else:
            assert r.shape == res_sum.shape, "levels must share N*C to be summed"
            res_sum = res_sum + r
    return res_sum


if __name__ == "__main__":
    # Small deterministic test: 5 feature levels, N=2, C=4, varying spatial.
    key = jax.random.PRNGKey(0)
    spatials = [16, 16, 8, 8, 4]
    img1, img2 = [], []
    for s in spatials:
        key, k1, k2 = jax.random.split(key, 3)
        img1.append(jax.random.normal(k1, (2, 4, s, s), dtype=jnp.float32))
        img2.append(jax.random.normal(k2, (2, 4, s, s), dtype=jnp.float32))

    out = lpips_metric(img1, img2)
    out = jax.block_until_ready(out)

    # Pure-JAX reference (same math as the PyTorch module).
    ref = 0.0
    for a, b in zip(img1, img2):
        d = (a - b) ** 2
        ref = ref + d.mean(axis=(2, 3)).reshape(-1)

    assert out.shape == (2 * 4,)
    assert jnp.allclose(out, ref, atol=1e-5, rtol=1e-5), "mismatch vs reference"

    print("KERNEL_OK")
</pallas_src>

<mosaic_0001>
module attributes {stable_mosaic.version = 11 : i64} {
  func.func @_mean_sq_diff_kernel(%arg0: i32, %arg1: i32, %arg2: memref<8x256xf32, #tpu.memory_space<vmem>>, %arg3: memref<8x256xf32, #tpu.memory_space<vmem>>, %arg4: memref<8x1xf32, #tpu.memory_space<vmem>>) attributes {dimension_semantics = [#tpu.dimension_semantics<parallel>, #tpu.dimension_semantics<arbitrary>], iteration_bounds = array<i64: 1, 1>, scalar_prefetch = 0 : i64, scratch_operands = 0 : i64, tpu.core_type = #tpu.core_type<tc>, window_params = [{transform_indices = @transform_0, window_bounds = array<i64: 8, 256>}, {transform_indices = @transform_1, window_bounds = array<i64: 8, 256>}, {transform_indices = @transform_2, window_bounds = array<i64: 8, 1>}]} {
    %c0_i32 = arith.constant 0 : i32
    %0 = arith.cmpi eq, %arg1, %c0_i32 : i32
    %1 = arith.extui %0 : i1 to i32
    %c0_i32_0 = arith.constant 0 : i32
    %2 = arith.cmpi ne, %1, %c0_i32_0 : i32
    scf.if %2 {
      %cst_10 = arith.constant 0.000000e+00 : f32
      %15 = vector.broadcast %cst_10 : f32 to vector<8x1xf32>
      %c0_11 = arith.constant 0 : index
      %c0_12 = arith.constant 0 : index
      %16 = vector.load %arg4[%c0_11, %c0_12] : memref<8x1xf32, #tpu.memory_space<vmem>>, vector<8x1xf32>
      tpu.vector_store %arg4[%c0_11, %c0_12], %15 {strides = array<i32>} : memref<8x1xf32, #tpu.memory_space<vmem>>, vector<8x1xf32>,
    } else {
    }
    %c0 = arith.constant 0 : index
    %c0_1 = arith.constant 0 : index
    %3 = vector.load %arg2[%c0, %c0_1] : memref<8x256xf32, #tpu.memory_space<vmem>>, vector<8x256xf32>
    %c0_2 = arith.constant 0 : index
    %c0_3 = arith.constant 0 : index
    %4 = vector.load %arg3[%c0_2, %c0_3] : memref<8x256xf32, #tpu.memory_space<vmem>>, vector<8x256xf32>
    %5 = arith.subf %3, %4 : vector<8x256xf32>
    %c0_4 = arith.constant 0 : index
    %c0_5 = arith.constant 0 : index
    %6 = vector.load %arg4[%c0_4, %c0_5] : memref<8x1xf32, #tpu.memory_space<vmem>>, vector<8x1xf32>
    %7 = arith.mulf %5, %5 : vector<8x256xf32>
    %cst = arith.constant dense<0.000000e+00> : vector<8xf32>
    %8 = vector.multi_reduction <add>, %7, %cst [1] : vector<8x256xf32> to vector<8xf32>
    %9 = vector.shape_cast %8 : vector<8xf32> to vector<8x1xf32>
    %10 = arith.addf %6, %9 : vector<8x1xf32>
    %c0_6 = arith.constant 0 : index
    %c0_7 = arith.constant 0 : index
    %11 = vector.load %arg4[%c0_6, %c0_7] : memref<8x1xf32, #tpu.memory_space<vmem>>, vector<8x1xf32>
    tpu.vector_store %arg4[%c0_6, %c0_7], %10 {strides = array<i32>} : memref<8x1xf32, #tpu.memory_space<vmem>>, vector<8x1xf32>,
    %c0_i32_8 = arith.constant 0 : i32
    %12 = arith.cmpi eq, %arg1, %c0_i32_8 : i32
    %13 = arith.extui %12 : i1 to i32
    %c0_i32_9 = arith.constant 0 : i32
    %14 = arith.cmpi ne, %13, %c0_i32_9 : i32
    scf.if %14 {
      %c0_10 = arith.constant 0 : index
      %c0_11 = arith.constant 0 : index
      %15 = vector.load %arg4[%c0_10, %c0_11] : memref<8x1xf32, #tpu.memory_space<vmem>>, vector<8x1xf32>
      %cst_12 = arith.constant 3.906250e-03 : f32
      %16 = vector.broadcast %cst_12 : f32 to vector<8x1xf32>
      %17 = arith.mulf %15, %16 : vector<8x1xf32>
      %c0_13 = arith.constant 0 : index
      %c0_14 = arith.constant 0 : index
      %18 = vector.load %arg4[%c0_13, %c0_14] : memref<8x1xf32, #tpu.memory_space<vmem>>, vector<8x1xf32>
      tpu.vector_store %arg4[%c0_13, %c0_14], %17 {strides = array<i32>} : memref<8x1xf32, #tpu.memory_space<vmem>>, vector<8x1xf32>,
    } else {
    }
    return
  }
  func.func @transform_0(%arg0: i32, %arg1: i32) -> (i32, i32) {
    %c0_i32 = arith.constant 0 : i32
    return %arg0, %arg1 : i32, i32
  }
  func.func @transform_1(%arg0: i32, %arg1: i32) -> (i32, i32) {
    %c0_i32 = arith.constant 0 : i32
    return %arg0, %arg1 : i32, i32
  }
  func.func @transform_2(%arg0: i32, %arg1: i32) -> (i32, i32) {
    %c0_i32 = arith.constant 0 : i32
    %c0_i32_0 = arith.constant 0 : i32
    return %arg0, %c0_i32 : i32, i32
  }
}

</mosaic_0001>

<bundles_post_ra>
// kernel: tpu_custom_call.1
= control target key start
LH: loop header
LB: loop body
LE: loop exit
PB: predicated region body
PF: predicated region fallthrough
CT: control target
= control target key end

     0   :  { %7 = vsyncpa [#allocation3], 0  ;;  %s169_s0 = inlined_call_operand.hbm [shape: f32[8,256], index: 0, kind: input, shape index: {}]   ;;  %s170_s1 = inlined_call_operand.hbm [shape: f32[8,256], index: 1, kind: input, shape index: {}]   ;;  %s171_s2 = inlined_call_operand.vmem [shape: f32[8,1], index: 2, kind: output, shape index: {}]  }
   0x1   :  { %s14_s11 = sshll.u32 %s169_s0, 4  ;;  %s15_s11 = int_to_ptr.hbm [resolvable:$true] %s14_s11 }
   0x2   :  { %8 = vsyncpa [#allocation5], 0  ;;  %s127_s12 = smov [#allocation2]   ;;  %s25_s16 = sshll.u32 %s170_s1, 4  ;;  %s26_s16 = int_to_ptr.hbm [resolvable:$true] %s25_s16 }
   0x3   :  { %s16_s13 = sshll.u32 %s127_s12, 4  ;;  %s128_s17 = smov [#allocation4]   ;;  %s17_s13 = int_to_ptr.vmem [resolvable:$true] %s16_s13 }
   0x4   :  { %19 = dma.hbm_to_vmem [thread:$0]  %s15_s11, 256, %s17_s13, [#allocation3]  }
   0x5   :  { %s27_s18 = sshll.u32 %s128_s17, 4  ;;  %s28_s18 = int_to_ptr.vmem [resolvable:$true] %s27_s18 }
   0x6   :  { %30 = dma.hbm_to_vmem [thread:$0]  %s26_s16, 256, %s28_s18, [#allocation5]  }
   0x7   :  { %123 = dma.done.wait [#allocation3], 256  }
   0x8   :  { %124 = vsyncadd [#allocation3], 4294967040 }
   0x9   :  { %125 = dma.done.wait [#allocation5], 256  }
   0xa   :  { %126 = vsyncadd [#allocation5], 4294967040  ;;  %vm43_vm0 = vcmask 7168   ;;  %v129_v0 = vmov 0.0   ;;  %v45_v1 = vld [vmem:[#allocation2] sm:$0xff]  ;;  %v46_v2 = vld [vmem:[#allocation2 + $0x8] sm:$0xff] }
   0xb   :  { %44 = vst.msk [vmem:[%s171_s2] sm:$0xff] %vm43_vm0, %v129_v0  ;;  %v47_v3 = vld [vmem:[#allocation4] sm:$0xff]  ;;  %v48_v4 = vld [vmem:[#allocation4 + $0x8] sm:$0xff] }
   0xc   :  { %v49_v5 = vsub.f32 %v45_v1, %v47_v3  ;;  %v50_v6 = vsub.f32 %v46_v2, %v48_v4 }
   0xe   :  { %v52_v7 = vmul.f32 %v49_v5, %v49_v5  ;;  %v53_v8 = vmul.f32 %v50_v6, %v50_v6 }
  0x10   :  { %v54_v9 = vadd.f32 %v53_v8, %v52_v7 }
  0x12   :  { %55 = vadd.xlane.f32.xlu0 %v54_v9  ;;  %v51_v10 = vld [vmem:[%s171_s2] sm:$0xff] }
  0x85   :  { %v56_v11 = vpop.xlane.xlu0 %55 }
  0x86   :  { %v57_v12 = vadd.f32 %v56_v11, %v51_v10 }
  0x88   :  { %59 = vst.msk [vmem:[%s171_s2] sm:$0xff] %vm43_vm0, %v57_v12 }
  0x8f   :  { %v63_v13 = vld [vmem:[%s171_s2] sm:$0xff] }
  0x90   :  { %v64_v14 = vmul.f32 0.00390625, %v63_v13 }
  0x92   :  { %65 = vst.msk [vmem:[%s171_s2] sm:$0xff] %vm43_vm0, %v64_v14 }
  0x93   :  { %70 = vsyncpa [#allocation3], 1 }
  0x94   :  { %71 = vsyncpa [#allocation5], 1 }

</bundles_post_ra>
